<compile_context>
chip_gen: v5e
topology: v5e:2x2
jax: 0.10.0
libtpu: 0.0.40
codegen_flags: <defaults>
</compile_context>

<pallas_src>
import jax
import jax.numpy as jnp
from jax import lax
from jax.experimental import pallas as pl
from jax.experimental.pallas import tpu as pltpu

HIDDEN = 64
SMALL_BATCH_THRESHOLD = 1024   # below this, plain XLA beats kernel launch cost
TB_MAX = 4096                  # max batch-tile rows per grid step
MIN_SPLIT_ROWS = 256           # don't split across 2 grid steps below this


def _round_up(x, m):
    return ((x + m - 1) // m) * m


def critic_kernel(x_ref, w1_ref, b1_ref, w2_ref, b2_ref, w3t_ref, b3_ref, o_ref):
    # x tile: (TB, state_dim). Weights stay resident in VMEM across the grid.
    x = x_ref[...]
    h1 = jnp.tanh(
        jnp.dot(x, w1_ref[...], preferred_element_type=jnp.float32) + b1_ref[...]
    )
    h2 = jnp.tanh(
        jnp.dot(h1, w2_ref[...], preferred_element_type=jnp.float32) + b2_ref[...]
    )
    # Lane-dense final layer: out^T = w3^T @ h2^T  -> shape (1, TB).
    # (NT-form dot_general: contract last dim of both operands; no explicit
    #  transpose materialized, result has batch on the lane axis.)
    out_t = lax.dot_general(
        w3t_ref[...], h2,
        dimension_numbers=(((1,), (1,)), ((), ())),
        preferred_element_type=jnp.float32,
    )
    o_ref[...] = (out_t + b3_ref[0, 0]).astype(o_ref.dtype)


def critic_reference(x, params):
    """Pure-JAX reference / small-batch fast path (same math as the kernel)."""
    w1, b1, w2, b2, w3t, b3 = params
    h1 = jnp.tanh(x @ w1 + b1)
    h2 = jnp.tanh(h1 @ w2 + b2)
    return h2 @ w3t.T + b3


def _pick_tiling(B, tb_max):
    """Pick (tile_rows, num_grid_steps). Even #steps (>=2) when splittable so
    the 'parallel' axis balances across v7x's two TensorCores."""
    if B <= tb_max:
        if B >= 2 * MIN_SPLIT_ROWS:
            num_steps = 2
            tb = _round_up(pl.cdiv(B, 2), 128)
        else:
            num_steps = 1
            tb = B                      # full-extent block: no (8,128) constraint
    else:
        num_steps = 2 * pl.cdiv(B, 2 * tb_max)   # even, >= 2
        tb = _round_up(pl.cdiv(B, num_steps), 128)
    return tb, num_steps


def critic_forward(x, params, *, tb_max=TB_MAX,
                   small_batch_threshold=SMALL_BATCH_THRESHOLD,
                   force_pallas=False):
    """x: (B, state_dim) float32 -> (B, 1) float32."""
    w1, b1, w2, b2, w3t, b3 = params
    B, state_dim = x.shape
    hidden = w1.shape[1]

    # Small-batch fast path: the standalone pallas_call is pure launch + DMA
    # prime overhead at RL per-step batch sizes; XLA fuses these 3 tiny matmuls.
    if not force_pallas and B < small_batch_threshold:
        return critic_reference(x, params)

    tb, num_steps = _pick_tiling(B, tb_max)
    b_pad = tb * num_steps
    if b_pad != B:
        x = jnp.pad(x, ((0, b_pad - B), (0, 0)))

    out_t = pl.pallas_call(
        critic_kernel,
        out_shape=jax.ShapeDtypeStruct((1, b_pad), jnp.float32),
        grid=(num_steps,),
        in_specs=[
            pl.BlockSpec((tb, state_dim), lambda i: (i, 0)),      # streamed x tile
            pl.BlockSpec((state_dim, hidden), lambda i: (0, 0)),  # w1 (resident)
            pl.BlockSpec((1, hidden), lambda i: (0, 0)),          # b1
            pl.BlockSpec((hidden, hidden), lambda i: (0, 0)),     # w2
            pl.BlockSpec((1, hidden), lambda i: (0, 0)),          # b2
            pl.BlockSpec((1, hidden), lambda i: (0, 0)),          # w3^T (lane-dense)
            pl.BlockSpec(memory_space=pltpu.SMEM),                # b3 scalar
        ],
        out_specs=pl.BlockSpec((1, tb), lambda i: (0, i)),
        compiler_params=pltpu.CompilerParams(
            dimension_semantics=("parallel",),
            # Headroom for TB up to 4096 (x lane-pads 8->128 lanes + two
            # (TB,64) intermediates ~ 10 MiB); v5e's scoped default is 16 MiB.
            vmem_limit_bytes=32 * 1024 * 1024,
        ),
    )(x, w1, b1, w2, b2, w3t, b3)

    # (1, B_pad) and (B_pad, 1) are the same row-major buffer -> free reshape,
    # then drop padded rows.
    return out_t.reshape(b_pad, 1)[:B]


def init_critic_params(key, state_dim, hidden=HIDDEN):
    """Deterministic init mimicking PyTorch nn.Linear default:
    U(-1/sqrt(fan_in), 1/sqrt(fan_in)) for both weights and biases."""
    ks = jax.random.split(key, 6)

    def linear(kw, kb, fan_in, fan_out):
        bound = 1.0 / jnp.sqrt(jnp.float32(fan_in))
        w = jax.random.uniform(kw, (fan_in, fan_out), jnp.float32, -bound, bound)
        b = jax.random.uniform(kb, (1, fan_out), jnp.float32, -bound, bound)
        return w, b

    w1, b1 = linear(ks[0], ks[1], state_dim, hidden)
    w2, b2 = linear(ks[2], ks[3], hidden, hidden)
    w3, b3 = linear(ks[4], ks[5], hidden, 1)
    w3t = w3.T  # (1, hidden): lane-dense layout for the final layer
    return (w1, b1, w2, b2, w3t, b3)  # b3 has shape (1, 1)


if __name__ == "__main__":
    key = jax.random.PRNGKey(0)
    k_param, k_x1, k_x2, k_x3 = jax.random.split(key, 4)

    state_dim = 8
    params = init_critic_params(k_param, state_dim)

    # 1) Small single-tile case, forced through the Pallas kernel (exercises
    #    the kernel itself at small shapes).
    x_small = jax.random.normal(k_x1, (8, state_dim), jnp.float32)
    out_small = jax.block_until_ready(critic_forward(x_small, params, force_pallas=True))
    ref_small = critic_reference(x_small, params)
    assert out_small.shape == (8, 1), out_small.shape
    assert jnp.allclose(out_small, ref_small, atol=1e-5, rtol=1e-5)

    # Same batch through the default dispatch -> XLA fast path.
    out_fast = jax.block_until_ready(critic_forward(x_small, params))
    assert out_fast.shape == (8, 1)
    assert jnp.allclose(out_fast, ref_small, atol=1e-5, rtol=1e-5)

    # 2) Large batch, B <= TB_MAX: 2 balanced grid steps (v7x megacore split),
    #    streamed tiles, resident weights, lane-dense output.
    x_big = jax.random.normal(k_x2, (2560, state_dim), jnp.float32)
    out_big = jax.block_until_ready(critic_forward(x_big, params))
    ref_big = critic_reference(x_big, params)
    assert out_big.shape == (2560, 1), out_big.shape
    assert jnp.allclose(out_big, ref_big, atol=1e-5, rtol=1e-5)

    # 3) Non-multiple batch: exercises padding + even-grid tiling + slice-off.
    x_pad = jax.random.normal(k_x3, (5000, state_dim), jnp.float32)
    out_pad = jax.block_until_ready(critic_forward(x_pad, params))
    ref_pad = critic_reference(x_pad, params)
    assert out_pad.shape == (5000, 1), out_pad.shape
    assert jnp.allclose(out_pad, ref_pad, atol=1e-5, rtol=1e-5)

    print("KERNEL_OK")
</pallas_src>

<mosaic_0001>
module attributes {stable_mosaic.version = 11 : i64} {
  func.func @critic_kernel(%arg0: i32, %arg1: memref<8x8xf32, #tpu.memory_space<vmem>>, %arg2: memref<8x64xf32, #tpu.memory_space<vmem>>, %arg3: memref<1x64xf32, #tpu.memory_space<vmem>>, %arg4: memref<64x64xf32, #tpu.memory_space<vmem>>, %arg5: memref<1x64xf32, #tpu.memory_space<vmem>>, %arg6: memref<1x64xf32, #tpu.memory_space<vmem>>, %arg7: memref<1x1xf32, #tpu.memory_space<smem>>, %arg8: memref<1x8xf32, #tpu.memory_space<vmem>>) attributes {dimension_semantics = [#tpu.dimension_semantics<parallel>], iteration_bounds = array<i64: 1>, scalar_prefetch = 0 : i64, scratch_operands = 0 : i64, tpu.core_type = #tpu.core_type<tc>, window_params = [{transform_indices = @transform_0, window_bounds = array<i64: 8, 8>}, {pipeline_mode = #tpu.pipeline_mode<synchronous>, transform_indices = @transform_1, window_bounds = array<i64: 8, 64>}, {pipeline_mode = #tpu.pipeline_mode<synchronous>, transform_indices = @transform_2, window_bounds = array<i64: 1, 64>}, {pipeline_mode = #tpu.pipeline_mode<synchronous>, transform_indices = @transform_3, window_bounds = array<i64: 64, 64>}, {pipeline_mode = #tpu.pipeline_mode<synchronous>, transform_indices = @transform_4, window_bounds = array<i64: 1, 64>}, {pipeline_mode = #tpu.pipeline_mode<synchronous>, transform_indices = @transform_5, window_bounds = array<i64: 1, 64>}, {transform_indices = @transform_6, window_bounds = array<i64: 1, 1>}, {transform_indices = @transform_7, window_bounds = array<i64: 1, 8>}]} {
    %c0 = arith.constant 0 : index
    %c0_0 = arith.constant 0 : index
    %0 = vector.load %arg1[%c0, %c0_0] : memref<8x8xf32, #tpu.memory_space<vmem>>, vector<8x8xf32>
    %c0_1 = arith.constant 0 : index
    %c0_2 = arith.constant 0 : index
    %1 = vector.load %arg2[%c0_1, %c0_2] : memref<8x64xf32, #tpu.memory_space<vmem>>, vector<8x64xf32>
    %cst = arith.constant dense<0.000000e+00> : vector<8x64xf32>
    %2 = tpu.matmul %0, %1, %cst {dimension_numbers = #tpu.dot_dimension_numbers<[1], [0], [0], [1], [0, 0, 1, 1], [], []>} : vector<8x8xf32>, vector<8x64xf32>, vector<8x64xf32> -> vector<8x64xf32>
    %c0_3 = arith.constant 0 : index
    %c0_4 = arith.constant 0 : index
    %3 = vector.load %arg3[%c0_3, %c0_4] : memref<1x64xf32, #tpu.memory_space<vmem>>, vector<1x64xf32>
    %4 = vector.broadcast %3 : vector<1x64xf32> to vector<8x64xf32>
    %5 = arith.addf %2, %4 : vector<8x64xf32>
    %6 = math.tanh %5 : vector<8x64xf32>
    %c0_5 = arith.constant 0 : index
    %c0_6 = arith.constant 0 : index
    %7 = vector.load %arg4[%c0_5, %c0_6] : memref<64x64xf32, #tpu.memory_space<vmem>>, vector<64x64xf32>
    %cst_7 = arith.constant dense<0.000000e+00> : vector<8x64xf32>
    %8 = tpu.matmul %6, %7, %cst_7 {dimension_numbers = #tpu.dot_dimension_numbers<[1], [0], [0], [1], [0, 0, 1, 1], [], []>} : vector<8x64xf32>, vector<64x64xf32>, vector<8x64xf32> -> vector<8x64xf32>
    %c0_8 = arith.constant 0 : index
    %c0_9 = arith.constant 0 : index
    %9 = vector.load %arg5[%c0_8, %c0_9] : memref<1x64xf32, #tpu.memory_space<vmem>>, vector<1x64xf32>
    %10 = vector.broadcast %9 : vector<1x64xf32> to vector<8x64xf32>
    %11 = arith.addf %8, %10 : vector<8x64xf32>
    %12 = math.tanh %11 : vector<8x64xf32>
    %c0_10 = arith.constant 0 : index
    %c0_11 = arith.constant 0 : index
    %13 = vector.load %arg6[%c0_10, %c0_11] : memref<1x64xf32, #tpu.memory_space<vmem>>, vector<1x64xf32>
    %cst_12 = arith.constant dense<0.000000e+00> : vector<1x8xf32>
    %14 = tpu.matmul %13, %12, %cst_12 {dimension_numbers = #tpu.dot_dimension_numbers<[1], [1], [0], [0], [0, 0, 1, 0], [], []>} : vector<1x64xf32>, vector<8x64xf32>, vector<1x8xf32> -> vector<1x8xf32>
    %c0_13 = arith.constant 0 : index
    %c0_14 = arith.constant 0 : index
    %15 = memref.load %arg7[%c0_13, %c0_14] : memref<1x1xf32, #tpu.memory_space<smem>>
    %16 = vector.broadcast %15 : f32 to vector<1x8xf32>
    %17 = arith.addf %14, %16 : vector<1x8xf32>
    %c0_15 = arith.constant 0 : index
    %c0_16 = arith.constant 0 : index
    %18 = vector.load %arg8[%c0_15, %c0_16] : memref<1x8xf32, #tpu.memory_space<vmem>>, vector<1x8xf32>
    tpu.vector_store %arg8[%c0_15, %c0_16], %17 {strides = array<i32>} : memref<1x8xf32, #tpu.memory_space<vmem>>, vector<1x8xf32>,
    return
  }
  func.func @transform_0(%arg0: i32) -> (i32, i32) {
    %c0_i32 = arith.constant 0 : i32
    %c0_i32_0 = arith.constant 0 : i32
    return %arg0, %c0_i32 : i32, i32
  }
  func.func @transform_1(%arg0: i32) -> (i32, i32) {
    %c0_i32 = arith.constant 0 : i32
    %c0_i32_0 = arith.constant 0 : i32
    %c0_i32_1 = arith.constant 0 : i32
    return %c0_i32, %c0_i32_0 : i32, i32
  }
  func.func @transform_2(%arg0: i32) -> (i32, i32) {
    %c0_i32 = arith.constant 0 : i32
    %c0_i32_0 = arith.constant 0 : i32
    %c0_i32_1 = arith.constant 0 : i32
    return %c0_i32, %c0_i32_0 : i32, i32
  }
  func.func @transform_3(%arg0: i32) -> (i32, i32) {
    %c0_i32 = arith.constant 0 : i32
    %c0_i32_0 = arith.constant 0 : i32
    %c0_i32_1 = arith.constant 0 : i32
    return %c0_i32, %c0_i32_0 : i32, i32
  }
  func.func @transform_4(%arg0: i32) -> (i32, i32) {
    %c0_i32 = arith.constant 0 : i32
    %c0_i32_0 = arith.constant 0 : i32
    %c0_i32_1 = arith.constant 0 : i32
    return %c0_i32, %c0_i32_0 : i32, i32
  }
  func.func @transform_5(%arg0: i32) -> (i32, i32) {
    %c0_i32 = arith.constant 0 : i32
    %c0_i32_0 = arith.constant 0 : i32
    %c0_i32_1 = arith.constant 0 : i32
    return %c0_i32, %c0_i32_0 : i32, i32
  }
  func.func @transform_6(%arg0: i32) -> (i32, i32) {
    %c0_i32 = arith.constant 0 : i32
    %c0_i32_0 = arith.constant 0 : i32
    %c0_i32_1 = arith.constant 0 : i32
    return %c0_i32, %c0_i32_0 : i32, i32
  }
  func.func @transform_7(%arg0: i32) -> (i32, i32) {
    %c0_i32 = arith.constant 0 : i32
    %c0_i32_0 = arith.constant 0 : i32
    return %c0_i32, %arg0 : i32, i32
  }
}

</mosaic_0001>

<bundles_post_ra>
// kernel: tpu_custom_call.1
= control target key start
LH: loop header
LB: loop body
LE: loop exit
PB: predicated region body
PF: predicated region fallthrough
CT: control target
= control target key end

     0   :  { %13 = vsyncpa [#allocation4], 0  ;;  %s376_s0 = inlined_call_operand.hbm [shape: f32[8,8], index: 0, kind: input, shape index: {}]   ;;  %s377_s1 = inlined_call_operand.hbm [shape: f32[8,64], index: 1, kind: input, shape index: {}]   ;;  %s378_s2 = inlined_call_operand.vmem [shape: f32[1,64], index: 2, kind: input, shape index: {}]   ;;  %s379_s3 = inlined_call_operand.hbm [shape: f32[64,64], index: 3, kind: input, shape index: {}]   ;;  %s380_s4 = inlined_call_operand.vmem [shape: f32[1,64], index: 4, kind: input, shape index: {}]   ;;  %s381_s5 = inlined_call_operand.vmem [shape: f32[1,64], index: 5, kind: input, shape index: {}]   ;;  %s382_s6 = inlined_call_operand.<no memory space> [shape: f32[1,1], index: 6, kind: input, shape index: {}]   ;;  %s383_s7 = inlined_call_operand.hbm [shape: f32[1,8], index: 7, kind: output, shape index: {}]  }
   0x1   :  { %14 = vsyncpa [#allocation7], 0  ;;  %s32_s26 = sshll.u32 %s377_s1, 4  ;;  %s33_s26 = int_to_ptr.hbm [resolvable:$true] %s32_s26 }
   0x2   :  { %15 = vsyncpa [#allocation5], 0  ;;  %s306_s27 = smov [#allocation6]   ;;  %s21_s8 = sshll.u32 %s376_s0, 4  ;;  %s22_s8 = int_to_ptr.hbm [resolvable:$true] %s21_s8 }
   0x3   :  { %s34_s28 = sshll.u32 %s306_s27, 4  ;;  %s307_s9 = smov [#allocation3]   ;;  %s35_s28 = int_to_ptr.vmem [resolvable:$true] %s34_s28 }
   0x4   :  { %37 = dma.hbm_to_vmem [thread:$0]  %s33_s26, 128, %s35_s28, [#allocation7]  }
   0x5   :  { %s23_s10 = sshll.u32 %s307_s9, 4  ;;  %s44_s13 = sshll.u32 %s379_s3, 4  ;;  %s24_s10 = int_to_ptr.vmem [resolvable:$true] %s23_s10  ;;  %s45_s13 = int_to_ptr.hbm [resolvable:$true] %s44_s13 }
   0x6   :  { %26 = dma.hbm_to_vmem [thread:$0]  %s22_s8, 128, %s24_s10, [#allocation4]  }
   0x7   :  { %s308_s1 = smov [#allocation8]   ;;  %s309_s15 = smov 128  }
   0x8   :  { %s46_s14 = sshll.u32 %s308_s1, 4  ;;  %s310_s16 = smov 8   ;;  %s47_s14 = int_to_ptr.vmem [resolvable:$true] %s46_s14 }
   0x9   :  { %52 = dma.hbm_to_vmem [thread:$0]  %s45_s13, 1024, %s47_s14, [#allocation7], %s309_s15, %s309_s15, %s310_s16  }
   0xa   :  { %300 = dma.done.wait [#allocation4], 128  }
   0xb   :  { %301 = vsyncadd [#allocation4], 4294967168 }
   0xc   :  { %302 = dma.done.wait [#allocation7], 1152  }
   0xd   :  { %303 = vsyncadd [#allocation7], 4294966144  ;;  %vm77_vm0 = vcmask 64512   ;;  %v72_v0 = vld [vmem:[#allocation6] sm:$0xff]  ;;  %v71_v1 = vld [vmem:[#allocation3] sm:$0xff]  ;;  %vm114_vm1 = vcmask 523264   ;;  %v141_v19 = vstv %s382_s6 }
   0xe   :  { %v109_v2 = vld [vmem:[#allocation8 + $0x38] sm:$0xff]  ;;  %96 = vmatpush.msra.mxu0 %v72_v0  ;;  %v108_v3 = vld [vmem:[#allocation8 + $0x30] sm:$0xff]  ;;  %v107_v4 = vld [vmem:[#allocation8 + $0x28] sm:$0xff]  ;;  %s311_s22 = smov [#allocation9]   ;;  %vm168_vm2 = vcmask 57344  }
   0xf   :  { %126 = vmatpush.msra.mxu1 %v109_v2  ;;  %188 = vmatmul.msk.f32.vlgmr.msra.gmra.mxu0 %vm77_vm0, %v71_v1  ;;  %v106_v5 = vld [vmem:[#allocation8 + $0x20] sm:$0xff]  ;;  %v105_v6 = vld [vmem:[#allocation8 + $0x18] sm:$0xff]  ;;  %v104_v7 = vld [vmem:[#allocation8 + $0x10] sm:$0xff]  ;;  %s175_s23 = sshll.u32 %s311_s22, 4  ;;  %s176_s23 = int_to_ptr.vmem [resolvable:$true] %s175_s23 }
  0x10   :  { %v103_v8 = vld [vmem:[#allocation8 + $0x8] sm:$0xff]  ;;  %v102_v9 = vld [vmem:[#allocation8] sm:$0xff]  ;;  %v198_v10 = vld [vmem:[%s378_s2] ss:$0 sm:$0xff] }
  0x11   :  { %127 = vmatpush.msra.mxu1 %v108_v3  ;;  %v199_v14 = vld [vmem:[%s380_s4] ss:$0 sm:$0xff]  ;;  %s177_s4 = sshll.u32 %s383_s7, 4  ;;  %s178_s4 = int_to_ptr.hbm [resolvable:$true] %s177_s4 }
  0x12   :  { %v139_v18 = vld [vmem:[%s381_s5] sm:$0x1] }
  0x13   :  { %128 = vmatpush.msra.mxu1 %v107_v4 }
  0x15   :  { %129 = vmatpush.msra.mxu1 %v106_v5 }
  0x17   :  { %130 = vmatpush.msra.mxu1 %v105_v6 }
  0x19   :  { %131 = vmatpush.msra.mxu1 %v104_v7 }
  0x1b   :  { %132 = vmatpush.msra.mxu1 %v103_v8 }
  0x1d   :  { %133 = vmatpush.msra.mxu1 %v102_v9 }
  0x8c   :  { %v98_v11 = vpop.f32.mrf.mxu0 }
  0x8d   :  { %v99_v12 = vadd.f32 %v198_v10, %v98_v11 }
  0x8f   :  { %200 = vtanh.f32 %v99_v12 }
  0x95   :  { %v201_v13 = vpop.eup %200 }
  0x96   :  { %189 = vmatmul.msk.f32.vlgmr.msra.gmra.mxu1 %vm114_vm1, %v201_v13 }
 0x113   :  { %v135_v15 = vpop.f32.mrf.mxu1 }
 0x114   :  { %v136_v16 = vadd.f32 %v199_v14, %v135_v15 }
 0x116   :  { %202 = vtanh.f32 %v136_v16 }
 0x11c   :  { %v203_v17 = vpop.eup %202 }
 0x11d   :  { %190 = vmatpush.xpose.msk.msra.mxu2 %vm114_vm1, %v203_v17 }
 0x120   :  { %191 = vmatmul.msk.f32.vlgmr.msra.gmra.mxu2 %vm114_vm1, %v139_v18 }
 0x1a3   :  { %v165_v20 = vpop.f32.mrf.mxu2 }
 0x1a4   :  { %v166_v21 = vadd.f32 %v165_v20, %v141_v19 }
 0x1a6   :  { %169 = vst.msk [vmem:[#allocation9] sm:$0x1] %vm168_vm2, %v166_v21 }
 0x1a7   :  { %180 = dma.vmem_to_hbm [thread:$0]  %s176_s23, 16, %s178_s4, [#allocation5]  }
 0x1a8   :  { %304 = dma.done.wait [#allocation5], 16  }
 0x1a9   :  { %305 = vsyncadd [#allocation5], 4294967280 }
 0x1aa   :  { %185 = vsyncpa [#allocation4], 1 }
 0x1ab   :  { %186 = vsyncpa [#allocation7], 1 }
 0x1ac   :  { %187 = vsyncpa [#allocation5], 1 }

</bundles_post_ra>
